<compile_context>
chip_gen: v6e
topology: v6e:2x2x1
jax: 0.10.0
libtpu: 0.0.40
codegen_flags: <defaults>
</compile_context>

<pallas_src>
import functools

import jax
import jax.numpy as jnp
from jax.experimental import pallas as pl
from jax.experimental.pallas import tpu as pltpu

_MIB = 1024 * 1024
_LANES = 128


def _round_up(x, m):
    return ((x + m - 1) // m) * m


def _ceil_div(a, b):
    return -(-a // b)


def _sublane_pack(itemsize):
    # sub-32-bit dtypes pack along sublanes: f32 -> 8, bf16 -> 16, int8 -> 32
    return {4: 8, 2: 16, 1: 32}.get(itemsize, 8)


def _num_tensorcores():
    """2 for 2-TensorCore parts (v7x, and v4/v5p megacore), else 1."""
    try:
        kind = jax.devices()[0].device_kind.lower()
    except Exception:
        return 1
    if "v7" in kind:
        return 2
    if ("v4" in kind or "v5p" in kind) and "lite" not in kind:
        return 2
    return 1


def _pick_nb(n, padded_row_bytes, target_tile_bytes, align, two_cores):
    """Rows per grid step.

    Targets ~target_tile_bytes of *padded* VMEM per input buffer; nb is a
    multiple of `align` (sublane pack, >= 8) unless it equals N, which keeps
    the 2-D (nb, C) output BlockSpec legal and lane/sublane dense.  On 2-TC
    parts we prefer an even (>= 2) grid step count so both cores get work.
    """
    nb = max(1, min(n, target_tile_bytes // max(1, padded_row_bytes)))
    if nb < n:
        nb = (nb // align) * align
        if nb == 0:
            nb = min(align, n)
    nb = min(nb, n)

    if two_cores and n > 1:
        steps = _ceil_div(n, nb)
        if steps % 2 == 1:
            if steps == 1:
                # Split a single step into two so the second TensorCore runs.
                cand = _round_up(_ceil_div(n, 2), align)
                if cand < n:
                    nb = cand
            else:
                # Prefer merging to steps-1 (bigger tiles) if it stays close
                # to the target; otherwise split to steps+1.
                cand = _round_up(_ceil_div(n, steps - 1), align)
                if (cand < n
                        and cand * padded_row_bytes <= int(1.6 * target_tile_bytes)
                        and _ceil_div(n, cand) % 2 == 0):
                    nb = cand
                else:
                    cand = max(align, (_ceil_div(n, steps + 1) // align) * align)
                    if _ceil_div(n, cand) % 2 == 0:
                        nb = min(nb, cand)
    return max(1, min(nb, n))


def _avg_kernel_flat(x_ref, o_ref, *, t, c, inv_t):
    # x_ref: (nb, T*C) tile, C % 128 == 0; o_ref: (nb, C) tile.
    # Static 128-aligned slices -> plain VPU adds, no sublane padding.
    acc = x_ref[:, 0:c].astype(jnp.float32)
    for ti in range(1, t):
        acc = acc + x_ref[:, ti * c:(ti + 1) * c].astype(jnp.float32)
    o_ref[...] = (acc * inv_t).astype(o_ref.dtype)


def _avg_kernel_3d(x_ref, o_ref, *, inv_t):
    # x_ref: (nb, T, C) tile; o_ref: (nb, C) tile.
    acc = jnp.sum(x_ref[...].astype(jnp.float32), axis=1)
    o_ref[...] = (acc * inv_t).astype(o_ref.dtype)


def segment_consensus(x, consensus_type="avg", dim=1, *,
                      target_tile_bytes=8 * _MIB):
    """Pallas implementation of SegmentConsensus.forward.

    x: (N, T, ...) array; dim must be 1 (the PyTorch module's default).
    'avg'      -> mean over dim=1 with keepdim, shape (N, 1, ...)
    'identity' -> x (no kernel launch)
    otherwise  -> None
    """
    if consensus_type == "identity":
        # Semantic no-op: do NOT burn an HBM read+write on a copy kernel.
        return x
    if consensus_type != "avg":
        return None

    assert dim == 1, "only dim=1 (segment axis) is supported"
    assert x.ndim >= 2, "expected at least (N, T) input"

    orig_shape = x.shape
    N, T = int(orig_shape[0]), int(orig_shape[1])
    C = 1
    for d in orig_shape[2:]:
        C *= int(d)
    C = max(C, 1)

    itemsize = jnp.dtype(x.dtype).itemsize
    pack = _sublane_pack(itemsize)
    align = pack                      # >= 8, keeps packed dtypes sublane-dense
    two_cores = _num_tensorcores() >= 2
    use_flat = (C % _LANES == 0)

    if use_flat:
        # (N, T*C): T no longer maps to sublanes -> zero padding, exact DMA.
        x_in = x.reshape(N, T * C)
        padded_row_bytes = _round_up(T * C, _LANES) * itemsize
        nb = _pick_nb(N, padded_row_bytes, target_tile_bytes, align, two_cores)
        in_tile_bytes = _round_up(nb, pack) * _round_up(T * C, _LANES) * itemsize
        kernel = functools.partial(_avg_kernel_flat, t=T, c=C, inv_t=1.0 / T)
        in_specs = [pl.BlockSpec((nb, T * C), lambda i: (i, 0))]
    else:
        # (N, T, C): T on sublanes (padded to `pack`), C on lanes (padded to 128).
        x_in = x.reshape(N, T, C)
        padded_row_bytes = _round_up(T, pack) * _round_up(C, _LANES) * itemsize
        nb = _pick_nb(N, padded_row_bytes, target_tile_bytes, align, two_cores)
        in_tile_bytes = nb * padded_row_bytes
        kernel = functools.partial(_avg_kernel_3d, inv_t=1.0 / T)
        in_specs = [pl.BlockSpec((nb, T, C), lambda i: (i, 0, 0))]

    grid = (_ceil_div(N, nb),)
    out_tile_bytes = _round_up(nb, pack) * _round_up(C, _LANES) * itemsize
    # Explicit scoped-VMEM allowance: 2x double-buffered input + 2x output + slack.
    vmem_limit = 2 * in_tile_bytes + 2 * out_tile_bytes + 4 * _MIB
    vmem_limit = int(min(max(vmem_limit, 16 * _MIB), 48 * _MIB))
    # TODO(synk): add a C-blocking grid axis if a single (1, T, C) row exceeds
    # the scoped-VMEM budget (very large flattened feature rows).

    cost = pl.CostEstimate(
        flops=N * T * C,                                  # the adds
        transcendentals=0,
        bytes_accessed=(N * T * C + N * C) * itemsize,    # read all, write N*C
    )

    out2d = pl.pallas_call(
        kernel,
        out_shape=jax.ShapeDtypeStruct((N, C), x.dtype),
        grid_spec=pltpu.PrefetchScalarGridSpec(
            num_scalar_prefetch=0,
            grid=grid,
            in_specs=in_specs,
            # Lane/sublane-dense 2-D output block (no size-1 sublane tile).
            out_specs=pl.BlockSpec((nb, C), lambda i: (i, 0)),
        ),
        compiler_params=pltpu.CompilerParams(
            dimension_semantics=("parallel",),
            vmem_limit_bytes=vmem_limit,
        ),
        cost_estimate=cost,
    )(x_in)

    return out2d.reshape((N, 1) + tuple(orig_shape[2:]))


if __name__ == "__main__":
    key = jax.random.PRNGKey(0)

    # Small test consistent with TSN: batch=2, num_segments=8, features=32
    # (C % 128 != 0 -> exercises the (N, T, C) path).
    N, T, C = 2, 8, 32
    x = jax.random.normal(key, (N, T, C), dtype=jnp.float32)

    out_avg = jax.block_until_ready(segment_consensus(x, "avg", dim=1))
    ref_avg = jnp.mean(x, axis=1, keepdims=True)
    assert out_avg.shape == (N, 1, C)
    assert jnp.allclose(out_avg, ref_avg, atol=1e-5, rtol=1e-5)

    # 'identity' consensus -> pass-through, no kernel.
    out_id = jax.block_until_ready(segment_consensus(x, "identity", dim=1))
    assert out_id.shape == (N, T, C)
    assert jnp.allclose(out_id, x)

    # Unknown type -> None (PyTorch parity).
    assert segment_consensus(x, "nope", dim=1) is None

    # C % 128 == 0 -> flattened (N, T*C) fast path.
    N2, T2, C2 = 16, 8, 256
    x2 = jax.random.normal(jax.random.PRNGKey(1), (N2, T2, C2), dtype=jnp.float32)
    out2 = jax.block_until_ready(segment_consensus(x2, "avg", dim=1))
    ref2 = jnp.mean(x2, axis=1, keepdims=True)
    assert out2.shape == (N2, 1, C2)
    assert jnp.allclose(out2, ref2, atol=1e-5, rtol=1e-5)

    # bf16 input: kernel accumulates in f32, result cast back to bf16.
    xb = x2.astype(jnp.bfloat16)
    outb = jax.block_until_ready(segment_consensus(xb, "avg", dim=1))
    refb = jnp.mean(xb.astype(jnp.float32), axis=1, keepdims=True).astype(jnp.bfloat16)
    assert outb.dtype == jnp.bfloat16
    assert jnp.allclose(outb.astype(jnp.float32), refb.astype(jnp.float32),
                        atol=2e-2, rtol=2e-2)

    # Prime N with a tiny tile budget -> multi-step grid with a ragged last
    # block (exercises cdiv grid + masked OOB output rows).
    N3, T3, C3 = 13, 3, 128
    x3 = jax.random.normal(jax.random.PRNGKey(2), (N3, T3, C3), dtype=jnp.float32)
    out3 = jax.block_until_ready(
        segment_consensus(x3, "avg", dim=1, target_tile_bytes=4096))
    ref3 = jnp.mean(x3, axis=1, keepdims=True)
    assert out3.shape == (N3, 1, C3)
    assert jnp.allclose(out3, ref3, atol=1e-5, rtol=1e-5)

    # 4-D input (N, T, H, W): trailing dims flattened to C and restored.
    N4, T4, H4, W4 = 2, 4, 8, 16
    x4 = jax.random.normal(jax.random.PRNGKey(3), (N4, T4, H4, W4), dtype=jnp.float32)
    out4 = jax.block_until_ready(segment_consensus(x4, "avg", dim=1))
    ref4 = jnp.mean(x4, axis=1, keepdims=True)
    assert out4.shape == (N4, 1, H4, W4)
    assert jnp.allclose(out4, ref4, atol=1e-5, rtol=1e-5)

    print("KERNEL_OK")
</pallas_src>

<mosaic_0001>
module attributes {stable_mosaic.version = 11 : i64} {
  func.func @_avg_kernel_3d(%arg0: i32, %arg1: memref<2x8x32xf32, #tpu.memory_space<vmem>>, %arg2: memref<2x32xf32, #tpu.memory_space<vmem>>) attributes {dimension_semantics = [#tpu.dimension_semantics<parallel>], iteration_bounds = array<i64: 1>, scalar_prefetch = 0 : i64, scratch_operands = 0 : i64, tpu.core_type = #tpu.core_type<tc>, window_params = [{transform_indices = @transform_0, window_bounds = array<i64: 2, 8, 32>}, {transform_indices = @transform_1, window_bounds = array<i64: 2, 32>}]} {
    %c0 = arith.constant 0 : index
    %c0_0 = arith.constant 0 : index
    %c0_1 = arith.constant 0 : index
    %0 = vector.load %arg1[%c0, %c0_0, %c0_1] : memref<2x8x32xf32, #tpu.memory_space<vmem>>, vector<2x8x32xf32>
    %cst = arith.constant dense<0.000000e+00> : vector<2x32xf32>
    %1 = vector.multi_reduction <add>, %0, %cst [1] : vector<2x8x32xf32> to vector<2x32xf32>
    %cst_2 = arith.constant 1.250000e-01 : f32
    %2 = vector.broadcast %cst_2 : f32 to vector<2x32xf32>
    %3 = arith.mulf %1, %2 : vector<2x32xf32>
    %c0_3 = arith.constant 0 : index
    %c0_4 = arith.constant 0 : index
    %4 = vector.load %arg2[%c0_3, %c0_4] : memref<2x32xf32, #tpu.memory_space<vmem>>, vector<2x32xf32>
    tpu.vector_store %arg2[%c0_3, %c0_4], %3 {strides = array<i32>} : memref<2x32xf32, #tpu.memory_space<vmem>>, vector<2x32xf32>,
    return
  }
  func.func @transform_0(%arg0: i32) -> (i32, i32, i32) {
    %c0_i32 = arith.constant 0 : i32
    %c0_i32_0 = arith.constant 0 : i32
    %c0_i32_1 = arith.constant 0 : i32
    return %arg0, %c0_i32, %c0_i32_0 : i32, i32, i32
  }
  func.func @transform_1(%arg0: i32) -> (i32, i32) {
    %c0_i32 = arith.constant 0 : i32
    %c0_i32_0 = arith.constant 0 : i32
    return %arg0, %c0_i32 : i32, i32
  }
}

</mosaic_0001>

<bundles_post_ra>
// kernel: tpu_custom_call.1
= control target key start
LH: loop header
LB: loop body
LE: loop exit
PB: predicated region body
PF: predicated region fallthrough
CT: control target
= control target key end

     0   :  { %6 = vsyncpa [#allocation3], 0  ;;  %s132_s0 = inlined_call_operand.hbm [shape: f32[2,8,32], index: 0, kind: input, shape index: {}]   ;;  %s133_s1 = inlined_call_operand.hbm [shape: f32[2,32], index: 1, kind: output, shape index: {}]  }
   0x1   :  { %7 = vsyncpa [#allocation4], 0  ;;  %s112_s6 = smov [#allocation2]  }
   0x2   :  { %s13_s7 = sshll.u32 %s112_s6, 4  ;;  %s14_s7 = int_to_ptr.vmem [resolvable:$true] %s13_s7 }
   0x3   :  { %s76_s8 = scalar_lea.vmem %s14_s7, 256  ;;  %p81_p1 = scmp.lt.s32.totalorder %s14_s7, %s14_s7 }
   0x4   :  { %p77_p0 = scmp.ne.s32.totalorder %s14_s7, %s76_s8  ;;  %p82_p2 = scmp.lt.s32.totalorder %s76_s8, %s76_s8 }
   0x6   :  { %p83_p3 = por %p82_p2, %p81_p1 }
   0x8   :  { %p84_p4 = pnand %p83_p3, %p77_p0 }
   0xa   :  { %87 = shalt.err (!%p84_p4)
}
   0xb   :  { %s113_s9 = smov 128   ;;  %s114_s10 = smov 8  }
   0xc   :  { %19 = dma.hbm_to_vmem [thread:$0]  %s132_s0, 256, %s14_s7, [#allocation3], %s113_s9, %s113_s9, %s114_s10  }
   0xd   :  { %108 = dma.done.wait [#allocation3], 256  }
   0xe   :  { %109 = vsyncadd [#allocation3], 4294967040  ;;  %vm25_vm0 = vcmask 261120   ;;  %v23_v0 = vld [vmem:[#allocation2] sm:$0xff]  ;;  %v24_v1 = vld [vmem:[#allocation2 + $0x8] sm:$0xff]  ;;  %s115_s0 = smov [#allocation5]  }
   0xf   :  { %v26_v2 = vsel %vm25_vm0, %v23_v0, 0.0  ;;  %v33_v3 = vsel %vm25_vm0, %v24_v1, 0.0  ;;  %s55_s13 = sshll.u32 %s115_s0, 4  ;;  %vm44_vm1 = vcmask 1041409   ;;  %vm47_vm2 = vcmask 254976   ;;  %s56_s13 = int_to_ptr.vmem [resolvable:$true] %s55_s13 }
  0x10   :  { %v27_v4 = vrot.slane %v26_v2, 4  ;;  %v34_v5 = vrot.slane %v33_v3, 4  ;;  %s88_s14 = scalar_lea.vmem %s56_s13, 32  ;;  %p93_p6 = scmp.lt.s32.totalorder %s56_s13, %s56_s13 }
  0x11   :  { %p89_p5 = scmp.ne.s32.totalorder %s56_s13, %s88_s14  ;;  %p94_p7 = scmp.lt.s32.totalorder %s88_s14, %s88_s14 }
  0x12   :  { %v28_v6 = vadd.f32 %v27_v4, %v26_v2  ;;  %v35_v7 = vadd.f32 %v34_v5, %v33_v3 }
  0x13   :  { %p95_p8 = por %p94_p7, %p93_p6 }
  0x14   :  { %v29_v8 = vrot.slane %v28_v6, 2  ;;  %v36_v9 = vrot.slane %v35_v7, 2 }
  0x15   :  { %p96_p9 = pnand %p95_p8, %p89_p5 }
  0x16   :  { %v30_v10 = vadd.f32 %v29_v8, %v28_v6  ;;  %v37_v11 = vadd.f32 %v36_v9, %v35_v7 }
  0x18   :  { %v31_v12 = vrot.slane %v30_v10, 1  ;;  %v38_v13 = vrot.slane %v37_v11, 1 }
  0x1a   :  { %v32_v14 = vadd.f32 %v31_v12, %v30_v10  ;;  %v39_v15 = vadd.f32 %v38_v13, %v37_v11 }
  0x1c   :  { %v40_v16 = vmul.f32 0.125, %v32_v14  ;;  %v41_v17 = vmul.f32 0.125, %v39_v15 }
  0x1e   :  { %v45_v18 = vsel %vm44_vm1, %v41_v17, %v40_v16 }
  0x1f   :  { %48 = vst.msk [vmem:[#allocation5] sm:$0x3] %vm47_vm2, %v45_v18 }
  0x20   :  { %99 = shalt.err (!%p96_p9)
}
  0x21   :  { %58 = dma.vmem_to_hbm [thread:$0]  %s56_s13, 32, %s133_s1, [#allocation4]  }
  0x22   :  { %110 = dma.done.wait [#allocation4], 32  }
  0x23   :  { %111 = vsyncadd [#allocation4], 4294967264 }
  0x24   :  { %62 = vsyncpa [#allocation3], 1 }
  0x25   :  { %63 = vsyncpa [#allocation4], 1 }

</bundles_post_ra>
